<compile_context>
chip_gen: v7x
topology: tpu7x:2x2x1
jax: 0.10.0
libtpu: 0.0.40
codegen_flags: <defaults>
</compile_context>

<pallas_src>
import functools
import math

import jax
import jax.numpy as jnp
from jax.experimental import pallas as pl
from jax.experimental.pallas import tpu as pltpu


# --------------------------------------------------------------------------- #
# Kernel
# --------------------------------------------------------------------------- #
def _sdm_loss_kernel(lab_col_ref, lab_row_ref, v_tile_ref, t_tile_ref,
                     v_full_ref, t_full_ref, out_ref, *,
                     tile_rows, batch, batch_padded,
                     logit_scale, epsilon, log_eps):
    """One row-tile of the (B, B) similarity KL; emits an (8, 128) partial sum."""
    padded = batch_padded != batch
    col_valid = None
    if padded:
        col_valid = (jax.lax.broadcasted_iota(jnp.int32, (1, batch_padded), 1)
                     < batch)

    # log(labels_distribute + eps) collapses to a per-row log + a VPU select,
    # exactly equal to the reference formula since labels_mat is 0/1 and
    # class-symmetric: log(1/rowsum + eps) on matches, log(eps) elsewhere.
    lab_mat = (lab_col_ref[...] - lab_row_ref[...] == 0.0).astype(jnp.float32)
    if padded:
        lab_mat = jnp.where(col_valid, lab_mat, 0.0)          # drop padded cols
    rowsum = jnp.sum(lab_mat, axis=1, keepdims=True)                  # (TM, 1)
    log_pos = jnp.log(1.0 / rowsum + epsilon)                         # (TM, 1)
    log_labels = jnp.where(lab_mat > 0.0, log_pos, log_eps)           # (TM, Bp)

    def row_kl(logits):
        # sum_j softmax_j * (log_softmax_j - L_j)
        #   = (1/s) * sum_j e_j * (z_j - L_j) - log(s)
        # fused: the dense softmax matrix and its B^2 divide never materialize.
        if padded:
            logits = jnp.where(col_valid, logits, -1e30)   # padded cols -> e=0
        m = jnp.max(logits, axis=1, keepdims=True)
        z = logits - m
        e = jnp.exp(z)
        s = jnp.sum(e, axis=1, keepdims=True)
        num = jnp.sum(e * (z - log_labels), axis=1, keepdims=True)
        return num / s - jnp.log(s)                                   # (TM, 1)

    # A @ B.T via contracting dims — two independent MXU matmuls, no XLU
    # transpose.  matmul -> KL -> matmul -> KL keeps only one (TM, Bp) logits
    # block (plus its softmax temporaries) live at a time.
    dimnums = (((1,), (1,)), ((), ()))
    vision_proj_text = logit_scale * jax.lax.dot_general(
        v_tile_ref[...], t_full_ref[...], dimnums,
        preferred_element_type=jnp.float32)                           # (TM, Bp)
    rows = row_kl(vision_proj_text)
    text_proj_image = logit_scale * jax.lax.dot_general(
        t_tile_ref[...], v_full_ref[...], dimnums,
        preferred_element_type=jnp.float32)                           # (TM, Bp)
    rows = rows + row_kl(text_proj_image)

    if padded:
        row0 = pl.program_id(0) * tile_rows
        row_ids = row0 + jax.lax.broadcasted_iota(jnp.int32, (tile_rows, 1), 0)
        rows = jnp.where(row_ids < batch, rows, 0.0)      # drop padded rows

    # Lane-dense (8, 128) unmasked store; the mean is finished in XLA.
    out_ref[0] = jnp.broadcast_to(jnp.sum(rows, axis=0, keepdims=True), (8, 128))


# --------------------------------------------------------------------------- #
# Wrapper
# --------------------------------------------------------------------------- #
def _pick_tile_rows(batch):
    """Row-tile policy: MXU-sized tiles (128/256) for large batches, >=2 grid
    blocks when the batch allows (v7x: both TensorCores on the parallel axis),
    rows a multiple of 8 (16 on the split path, bf16-pack friendly)."""
    if batch >= 512:
        return 256
    if batch >= 192:
        return 128
    if batch >= 32:
        half = (batch + 1) // 2
        return -(-half // 16) * 16
    return -(-batch // 8) * 8


def _resident_spec(block_shape, index_map, single_buffer):
    """BlockSpec for a block whose index never changes (stays resident in VMEM).

    Best effort: request a single pipeline buffer — double-buffering a
    constant-index block costs VMEM without adding any overlap.  Falls back to
    the default spec on JAX builds without `pipeline_mode=pl.Buffered(...)`."""
    if single_buffer and hasattr(pl, "Buffered"):
        try:
            return pl.BlockSpec(block_shape, index_map,
                                pipeline_mode=pl.Buffered(1))
        except Exception:
            pass
    return pl.BlockSpec(block_shape, index_map)


def sdm_loss(vision_features, text_features, labels, length, epsilon=1e-8,
             block_rows=None, matmul_dtype=jnp.bfloat16):
    """Similarity Distribution Matching loss (forward) as a Pallas TPU kernel.

    vision_features, text_features: (B, D); labels: (B,) or (B, 1) class ids.
    `matmul_dtype` applies to the MXU operands only; KL math stays f32."""
    v = jnp.asarray(vision_features, jnp.float32)
    t = jnp.asarray(text_features, jnp.float32)
    batch, dim = v.shape
    logit_scale = float(length)

    # (1) L2-normalize once, in plain XLA — the kernel never re-normalizes.
    v = v / jnp.linalg.norm(v, axis=1, keepdims=True)
    t = t / jnp.linalg.norm(t, axis=1, keepdims=True)

    # (2) Tiling: lane-dense D (pad to 128) and MXU-friendly row tiles; the
    # batch is padded to a tile multiple, padded rows/cols masked in-kernel.
    if block_rows is None:
        tile_rows = _pick_tile_rows(batch)
    else:
        assert block_rows % 8 == 0, "block_rows must be a multiple of 8"
        tile_rows = block_rows
    dim_p = -(-dim // 128) * 128
    batch_p = -(-batch // tile_rows) * tile_rows
    n_blocks = batch_p // tile_rows

    pad_r, pad_c = batch_p - batch, dim_p - dim
    if pad_r or pad_c:
        v = jnp.pad(v, ((0, pad_r), (0, pad_c)))
        t = jnp.pad(t, ((0, pad_r), (0, pad_c)))

    # (3) bf16 MXU operands by default (halves HBM/VMEM traffic, ~4x MXU
    # throughput); accumulation and all KL math remain f32 inside the kernel.
    v = v.astype(matmul_dtype)
    t = t.astype(matmul_dtype)

    lab_col = jnp.asarray(labels, jnp.float32).reshape(batch, 1)
    if pad_r:
        lab_col = jnp.pad(lab_col, ((0, pad_r), (0, 0)))
    lab_row = lab_col.reshape(1, batch_p)   # transpose hoisted out of the kernel

    kernel = functools.partial(
        _sdm_loss_kernel,
        tile_rows=tile_rows, batch=batch, batch_padded=batch_p,
        logit_scale=logit_scale, epsilon=float(epsilon),
        log_eps=float(math.log(epsilon)))

    feat_bytes = jnp.dtype(matmul_dtype).itemsize
    # VMEM budget (worst case: single-buffer hint ignored, residents doubled).
    vmem_bytes = (4 * batch_p * dim_p * feat_bytes        # v_full, t_full
                  + 4 * tile_rows * dim_p * feat_bytes    # v_tile, t_tile
                  + 2 * batch_p * 4 + 2 * tile_rows * 4   # labels
                  + 8 * tile_rows * batch_p * 4           # logits + temporaries
                  + 2 * 8 * 128 * 4                       # output blocks
                  + (2 << 20))                            # slack
    vmem_limit = int(min(max(vmem_bytes, 8 << 20), 96 << 20))
    cost = pl.CostEstimate(
        flops=4 * batch_p * batch_p * dim_p,
        transcendentals=2 * batch_p * batch_p + 2 * batch_p,
        bytes_accessed=int(4 * batch_p * dim_p * feat_bytes + 8 * batch_p
                           + n_blocks * 8 * 128 * 4))

    # TODO(synk): for batches where 2*B*Dp no longer fits VMEM, move v/t to
    # memory_space=pl.ANY and stream column tiles via pltpu.emit_pipeline with
    # an online-softmax row-KL accumulation.
    def run(single_buffer_residents):
        in_specs = [
            pl.BlockSpec((tile_rows, 1), lambda i: (i, 0)),        # labels (col)
            _resident_spec((1, batch_p), lambda i: (0, 0),
                           single_buffer_residents),               # labels (row)
            pl.BlockSpec((tile_rows, dim_p), lambda i: (i, 0)),    # vision tile
            pl.BlockSpec((tile_rows, dim_p), lambda i: (i, 0)),    # text tile
            _resident_spec((batch_p, dim_p), lambda i: (0, 0),
                           single_buffer_residents),               # vision (full)
            _resident_spec((batch_p, dim_p), lambda i: (0, 0),
                           single_buffer_residents),               # text (full)
        ]
        return pl.pallas_call(
            kernel,
            out_shape=jax.ShapeDtypeStruct((n_blocks, 8, 128), jnp.float32),
            grid_spec=pltpu.PrefetchScalarGridSpec(
                num_scalar_prefetch=0,
                grid=(n_blocks,),
                in_specs=in_specs,
                out_specs=pl.BlockSpec((1, 8, 128), lambda i: (i, 0, 0))),
            compiler_params=pltpu.CompilerParams(
                dimension_semantics=("parallel",),
                vmem_limit_bytes=vmem_limit),
            cost_estimate=cost,
        )(lab_col, lab_row, v, t, v, t)

    try:
        out = run(True)
    except Exception:
        # This JAX/Mosaic build does not accept Buffered(1); use default buffers.
        out = run(False)

    # Mean over the real batch (padded rows contribute exact zeros).
    return jnp.sum(out[:, 0, 0]) / jnp.float32(batch)


# --------------------------------------------------------------------------- #
# Pure-JAX reference (mirrors the PyTorch forward pass)
# --------------------------------------------------------------------------- #
def _sdm_loss_ref(vision_features, text_features, labels, length,
                  epsilon=1e-8, feature_cast=None):
    labels = jnp.asarray(labels, jnp.float32).reshape(-1, 1)
    lab = (labels - labels.T == 0).astype(jnp.float32)
    image_norm = vision_features / jnp.linalg.norm(vision_features, axis=1,
                                                   keepdims=True)
    text_norm = text_features / jnp.linalg.norm(text_features, axis=1,
                                                keepdims=True)
    if feature_cast is not None:   # emulate quantized MXU operands
        image_norm = image_norm.astype(feature_cast).astype(jnp.float32)
        text_norm = text_norm.astype(feature_cast).astype(jnp.float32)
    t2i = text_norm @ image_norm.T
    i2t = t2i.T
    text_proj_image = length * t2i
    vision_proj_text = length * i2t
    labels_dist = lab / jnp.sum(lab, axis=1)
    i2t_pred = jax.nn.softmax(vision_proj_text, axis=1)
    i2t_loss = i2t_pred * (jax.nn.log_softmax(vision_proj_text, axis=1)
                           - jnp.log(labels_dist + epsilon))
    t2i_pred = jax.nn.softmax(text_proj_image, axis=1)
    t2i_loss = t2i_pred * (jax.nn.log_softmax(text_proj_image, axis=1)
                           - jnp.log(labels_dist + epsilon))
    return jnp.mean(jnp.sum(i2t_loss, axis=1)) + jnp.mean(jnp.sum(t2i_loss, axis=1))


if __name__ == "__main__":
    # Test 1: tiny batch, f32 matmul operands — strict parity with reference.
    B, D = 8, 32
    length = float(B)
    kv, kt = jax.random.split(jax.random.PRNGKey(0))
    vision = jax.random.normal(kv, (B, D), dtype=jnp.float32)
    text = jax.random.normal(kt, (B, D), dtype=jnp.float32)
    labels = jnp.array([0, 1, 0, 1, 2, 2, 3, 0], dtype=jnp.float32).reshape(B, 1)
    loss = jax.block_until_ready(
        sdm_loss(vision, text, labels, length, matmul_dtype=jnp.float32))
    ref = _sdm_loss_ref(vision, text, labels, length)
    assert jnp.allclose(loss, ref, rtol=1e-5, atol=1e-5), (loss, ref)

    # Test 2: multi-block "parallel" grid (explicit block_rows), f32 operands.
    B2, D2 = 32, 96
    k1, k2, k3 = jax.random.split(jax.random.PRNGKey(0), 3)
    vision2 = jax.random.normal(k1, (B2, D2), dtype=jnp.float32)
    text2 = jax.random.normal(k2, (B2, D2), dtype=jnp.float32)
    labels2 = jax.random.randint(k3, (B2, 1), 0, 5).astype(jnp.float32)
    loss2 = jax.block_until_ready(
        sdm_loss(vision2, text2, labels2, 8.0, block_rows=8,
                 matmul_dtype=jnp.float32))
    ref2 = _sdm_loss_ref(vision2, text2, labels2, 8.0)
    assert jnp.allclose(loss2, ref2, rtol=1e-4, atol=1e-4), (loss2, ref2)

    # Test 3: default tile policy with row + column padding / in-kernel masking
    # (B=40 -> 2 blocks of 32 padded rows, D=50 -> 128 lanes), f32 operands.
    B3, D3 = 40, 50
    k4, k5, k6 = jax.random.split(jax.random.PRNGKey(0), 3)
    vision3 = jax.random.normal(k4, (B3, D3), dtype=jnp.float32)
    text3 = jax.random.normal(k5, (B3, D3), dtype=jnp.float32)
    labels3 = jax.random.randint(k6, (B3,), 0, 7).astype(jnp.float32)
    loss3 = jax.block_until_ready(
        sdm_loss(vision3, text3, labels3, 10.0, matmul_dtype=jnp.float32))
    ref3 = _sdm_loss_ref(vision3, text3, labels3, 10.0)
    assert jnp.allclose(loss3, ref3, rtol=1e-4, atol=1e-4), (loss3, ref3)

    # Test 4: default configuration (bf16 MXU operands, default tiling).
    loss4 = jax.block_until_ready(sdm_loss(vision2, text2, labels2, 8.0))
    ref4 = _sdm_loss_ref(vision2, text2, labels2, 8.0, feature_cast=jnp.bfloat16)
    assert jnp.allclose(loss4, ref4, rtol=1e-3, atol=1e-3), (loss4, ref4)
    assert jnp.allclose(loss4, ref2, rtol=5e-2, atol=5e-2), (loss4, ref2)

    print("KERNEL_OK")
</pallas_src>

<mosaic_0001>
module attributes {stable_mosaic.version = 11 : i64} {
  func.func @_sdm_loss_kernel(%arg0: i32, %arg1: memref<8x1xf32, #tpu.memory_space<vmem>>, %arg2: memref<1x8xf32, #tpu.memory_space<vmem>>, %arg3: memref<8x128xf32, #tpu.memory_space<vmem>>, %arg4: memref<8x128xf32, #tpu.memory_space<vmem>>, %arg5: memref<8x128xf32, #tpu.memory_space<vmem>>, %arg6: memref<8x128xf32, #tpu.memory_space<vmem>>, %arg7: memref<1x8x128xf32, #tpu.memory_space<vmem>>) attributes {dimension_semantics = [#tpu.dimension_semantics<parallel>], iteration_bounds = array<i64: 1>, scalar_prefetch = 0 : i64, scratch_operands = 0 : i64, tpu.core_type = #tpu.core_type<tc>, window_params = [{transform_indices = @transform_0, window_bounds = array<i64: 8, 1>}, {pipeline_mode = #tpu.pipeline_mode<synchronous>, transform_indices = @transform_1, window_bounds = array<i64: 1, 8>}, {transform_indices = @transform_2, window_bounds = array<i64: 8, 128>}, {transform_indices = @transform_3, window_bounds = array<i64: 8, 128>}, {pipeline_mode = #tpu.pipeline_mode<synchronous>, transform_indices = @transform_4, window_bounds = array<i64: 8, 128>}, {pipeline_mode = #tpu.pipeline_mode<synchronous>, transform_indices = @transform_5, window_bounds = array<i64: 8, 128>}, {transform_indices = @transform_6, window_bounds = array<i64: 1, 8, 128>}]} {
    %c0 = arith.constant 0 : index
    %c0_0 = arith.constant 0 : index
    %0 = vector.load %arg1[%c0, %c0_0] : memref<8x1xf32, #tpu.memory_space<vmem>>, vector<8x1xf32>
    %c0_1 = arith.constant 0 : index
    %c0_2 = arith.constant 0 : index
    %1 = vector.load %arg2[%c0_1, %c0_2] : memref<1x8xf32, #tpu.memory_space<vmem>>, vector<1x8xf32>
    %2 = vector.broadcast %0 : vector<8x1xf32> to vector<8x8xf32>
    %3 = vector.broadcast %1 : vector<1x8xf32> to vector<8x8xf32>
    %4 = arith.subf %2, %3 : vector<8x8xf32>
    %cst = arith.constant 0.000000e+00 : f32
    %5 = vector.broadcast %cst : f32 to vector<8x8xf32>
    %6 = arith.cmpf oeq, %4, %5 : vector<8x8xf32>
    %7 = arith.extui %6 : vector<8x8xi1> to vector<8x8xi32>
    %8 = arith.sitofp %7 : vector<8x8xi32> to vector<8x8xf32>
    %cst_3 = arith.constant dense<0.000000e+00> : vector<8xf32>
    %9 = vector.multi_reduction <add>, %8, %cst_3 [1] : vector<8x8xf32> to vector<8xf32>
    %10 = vector.shape_cast %9 : vector<8xf32> to vector<8x1xf32>
    %cst_4 = arith.constant 1.000000e+00 : f32
    %11 = vector.broadcast %cst_4 : f32 to vector<8x1xf32>
    %12 = arith.divf %11, %10 : vector<8x1xf32>
    %cst_5 = arith.constant 9.99999993E-9 : f32
    %13 = vector.broadcast %cst_5 : f32 to vector<8x1xf32>
    %14 = arith.addf %12, %13 : vector<8x1xf32>
    %15 = math.log %14 : vector<8x1xf32>
    %cst_6 = arith.constant 0.000000e+00 : f32
    %16 = vector.broadcast %cst_6 : f32 to vector<8x8xf32>
    %17 = arith.cmpf ogt, %8, %16 : vector<8x8xf32>
    %cst_7 = arith.constant -18.420681 : f32
    %18 = vector.shape_cast %15 : vector<8x1xf32> to vector<8x1xf32>
    %19 = vector.broadcast %18 : vector<8x1xf32> to vector<8x8xf32>
    %20 = vector.broadcast %cst_7 : f32 to vector<8x8xf32>
    %21 = arith.select %17, %19, %20 : vector<8x8xi1>, vector<8x8xf32>
    %c0_8 = arith.constant 0 : index
    %c0_9 = arith.constant 0 : index
    %22 = vector.load %arg3[%c0_8, %c0_9] : memref<8x128xf32, #tpu.memory_space<vmem>>, vector<8x128xf32>
    %c0_10 = arith.constant 0 : index
    %c0_11 = arith.constant 0 : index
    %23 = vector.load %arg6[%c0_10, %c0_11] : memref<8x128xf32, #tpu.memory_space<vmem>>, vector<8x128xf32>
    %cst_12 = arith.constant dense<0.000000e+00> : vector<8x8xf32>
    %24 = tpu.matmul %22, %23, %cst_12 {dimension_numbers = #tpu.dot_dimension_numbers<[1], [1], [0], [0], [0, 0, 1, 0], [], []>} : vector<8x128xf32>, vector<8x128xf32>, vector<8x8xf32> -> vector<8x8xf32>
    %cst_13 = arith.constant 8.000000e+00 : f32
    %25 = vector.broadcast %cst_13 : f32 to vector<8x8xf32>
    %26 = arith.mulf %25, %24 : vector<8x8xf32>
    %cst_14 = arith.constant dense<0xFF800000> : vector<8xf32>
    %27 = vector.multi_reduction <maximumf>, %26, %cst_14 [1] : vector<8x8xf32> to vector<8xf32>
    %28 = vector.shape_cast %27 : vector<8xf32> to vector<8x1xf32>
    %29 = vector.broadcast %28 : vector<8x1xf32> to vector<8x8xf32>
    %30 = arith.subf %26, %29 : vector<8x8xf32>
    %31 = math.exp %30 : vector<8x8xf32>
    %cst_15 = arith.constant dense<0.000000e+00> : vector<8xf32>
    %32 = vector.multi_reduction <add>, %31, %cst_15 [1] : vector<8x8xf32> to vector<8xf32>
    %33 = vector.shape_cast %32 : vector<8xf32> to vector<8x1xf32>
    %34 = arith.subf %30, %21 : vector<8x8xf32>
    %35 = arith.mulf %31, %34 : vector<8x8xf32>
    %cst_16 = arith.constant dense<0.000000e+00> : vector<8xf32>
    %36 = vector.multi_reduction <add>, %35, %cst_16 [1] : vector<8x8xf32> to vector<8xf32>
    %37 = vector.shape_cast %36 : vector<8xf32> to vector<8x1xf32>
    %38 = arith.divf %37, %33 : vector<8x1xf32>
    %39 = math.log %33 : vector<8x1xf32>
    %40 = arith.subf %38, %39 : vector<8x1xf32>
    %c0_17 = arith.constant 0 : index
    %c0_18 = arith.constant 0 : index
    %41 = vector.load %arg4[%c0_17, %c0_18] : memref<8x128xf32, #tpu.memory_space<vmem>>, vector<8x128xf32>
    %c0_19 = arith.constant 0 : index
    %c0_20 = arith.constant 0 : index
    %42 = vector.load %arg5[%c0_19, %c0_20] : memref<8x128xf32, #tpu.memory_space<vmem>>, vector<8x128xf32>
    %cst_21 = arith.constant dense<0.000000e+00> : vector<8x8xf32>
    %43 = tpu.matmul %41, %42, %cst_21 {dimension_numbers = #tpu.dot_dimension_numbers<[1], [1], [0], [0], [0, 0, 1, 0], [], []>} : vector<8x128xf32>, vector<8x128xf32>, vector<8x8xf32> -> vector<8x8xf32>
    %cst_22 = arith.constant 8.000000e+00 : f32
    %44 = vector.broadcast %cst_22 : f32 to vector<8x8xf32>
    %45 = arith.mulf %44, %43 : vector<8x8xf32>
    %cst_23 = arith.constant dense<0xFF800000> : vector<8xf32>
    %46 = vector.multi_reduction <maximumf>, %45, %cst_23 [1] : vector<8x8xf32> to vector<8xf32>
    %47 = vector.shape_cast %46 : vector<8xf32> to vector<8x1xf32>
    %48 = vector.broadcast %47 : vector<8x1xf32> to vector<8x8xf32>
    %49 = arith.subf %45, %48 : vector<8x8xf32>
    %50 = math.exp %49 : vector<8x8xf32>
    %cst_24 = arith.constant dense<0.000000e+00> : vector<8xf32>
    %51 = vector.multi_reduction <add>, %50, %cst_24 [1] : vector<8x8xf32> to vector<8xf32>
    %52 = vector.shape_cast %51 : vector<8xf32> to vector<8x1xf32>
    %53 = arith.subf %49, %21 : vector<8x8xf32>
    %54 = arith.mulf %50, %53 : vector<8x8xf32>
    %cst_25 = arith.constant dense<0.000000e+00> : vector<8xf32>
    %55 = vector.multi_reduction <add>, %54, %cst_25 [1] : vector<8x8xf32> to vector<8xf32>
    %56 = vector.shape_cast %55 : vector<8xf32> to vector<8x1xf32>
    %57 = arith.divf %56, %52 : vector<8x1xf32>
    %58 = math.log %52 : vector<8x1xf32>
    %59 = arith.subf %57, %58 : vector<8x1xf32>
    %60 = arith.addf %40, %59 : vector<8x1xf32>
    %cst_26 = arith.constant dense<0.000000e+00> : vector<1xf32>
    %61 = vector.multi_reduction <add>, %60, %cst_26 [0] : vector<8x1xf32> to vector<1xf32>
    %62 = vector.shape_cast %61 : vector<1xf32> to vector<1x1xf32>
    %63 = vector.shape_cast %62 : vector<1x1xf32> to vector<1x1xf32>
    %64 = vector.broadcast %63 : vector<1x1xf32> to vector<8x128xf32>
    %c0_27 = arith.constant 0 : index
    %c0_28 = arith.constant 0 : index
    %c0_29 = arith.constant 0 : index
    %65 = vector.load %arg7[%c0_27, %c0_28, %c0_29] : memref<1x8x128xf32, #tpu.memory_space<vmem>>, vector<1x8x128xf32>
    %66 = vector.shape_cast %65 : vector<1x8x128xf32> to vector<8x128xf32>
    %67 = vector.shape_cast %64 : vector<8x128xf32> to vector<1x8x128xf32>
    tpu.vector_store %arg7[%c0_27, %c0_28, %c0_29], %67 {strides = array<i32>} : memref<1x8x128xf32, #tpu.memory_space<vmem>>, vector<1x8x128xf32>,
    return
  }
  func.func @transform_0(%arg0: i32) -> (i32, i32) {
    %c0_i32 = arith.constant 0 : i32
    %c0_i32_0 = arith.constant 0 : i32
    return %arg0, %c0_i32 : i32, i32
  }
  func.func @transform_1(%arg0: i32) -> (i32, i32) {
    %c0_i32 = arith.constant 0 : i32
    %c0_i32_0 = arith.constant 0 : i32
    %c0_i32_1 = arith.constant 0 : i32
    return %c0_i32, %c0_i32_0 : i32, i32
  }
  func.func @transform_2(%arg0: i32) -> (i32, i32) {
    %c0_i32 = arith.constant 0 : i32
    %c0_i32_0 = arith.constant 0 : i32
    return %arg0, %c0_i32 : i32, i32
  }
  func.func @transform_3(%arg0: i32) -> (i32, i32) {
    %c0_i32 = arith.constant 0 : i32
    %c0_i32_0 = arith.constant 0 : i32
    return %arg0, %c0_i32 : i32, i32
  }
  func.func @transform_4(%arg0: i32) -> (i32, i32) {
    %c0_i32 = arith.constant 0 : i32
    %c0_i32_0 = arith.constant 0 : i32
    %c0_i32_1 = arith.constant 0 : i32
    return %c0_i32, %c0_i32_0 : i32, i32
  }
  func.func @transform_5(%arg0: i32) -> (i32, i32) {
    %c0_i32 = arith.constant 0 : i32
    %c0_i32_0 = arith.constant 0 : i32
    %c0_i32_1 = arith.constant 0 : i32
    return %c0_i32, %c0_i32_0 : i32, i32
  }
  func.func @transform_6(%arg0: i32) -> (i32, i32, i32) {
    %c0_i32 = arith.constant 0 : i32
    %c0_i32_0 = arith.constant 0 : i32
    %c0_i32_1 = arith.constant 0 : i32
    return %arg0, %c0_i32, %c0_i32_0 : i32, i32, i32
  }
}

module attributes {stable_mosaic.version = 11 : i64} {
  func.func @_sdm_loss_kernel(%arg0: i32, %arg1: memref<8x1xf32, #tpu.memory_space<vmem>>, %arg2: memref<1x8xf32, #tpu.memory_space<vmem>>, %arg3: memref<8x128xf32, #tpu.memory_space<vmem>>, %arg4: memref<8x128xf32, #tpu.memory_space<vmem>>, %arg5: memref<8x128xf32, #tpu.memory_space<vmem>>, %arg6: memref<8x128xf32, #tpu.memory_space<vmem>>, %arg7: memref<1x8x128xf32, #tpu.memory_space<vmem>>) attributes {dimension_semantics = [#tpu.dimension_semantics<parallel>], iteration_bounds = array<i64: 1>, scalar_prefetch = 0 : i64, scratch_operands = 0 : i64, tpu.core_type = #tpu.core_type<tc>, window_params = [{transform_indices = @transform_0, window_bounds = array<i64: 8, 1>}, {pipeline_mode = #tpu.pipeline_mode<synchronous>, transform_indices = @transform_1, window_bounds = array<i64: 1, 8>}, {transform_indices = @transform_2, window_bounds = array<i64: 8, 128>}, {transform_indices = @transform_3, window_bounds = array<i64: 8, 128>}, {pipeline_mode = #tpu.pipeline_mode<synchronous>, transform_indices = @transform_4, window_bounds = array<i64: 8, 128>}, {pipeline_mode = #tpu.pipeline_mode<synchronous>, transform_indices = @transform_5, window_bounds = array<i64: 8, 128>}, {transform_indices = @transform_6, window_bounds = array<i64: 1, 8, 128>}]} {
    %c0 = arith.constant 0 : index
    %c0_0 = arith.constant 0 : index
    %0 = vector.load %arg1[%c0, %c0_0] : memref<8x1xf32, #tpu.memory_space<vmem>>, vector<8x1xf32>
    %c0_1 = arith.constant 0 : index
    %c0_2 = arith.constant 0 : index
    %1 = vector.load %arg2[%c0_1, %c0_2] : memref<1x8xf32, #tpu.memory_space<vmem>>, vector<1x8xf32>
    %2 = vector.broadcast %0 : vector<8x1xf32> to vector<8x8xf32>
    %3 = vector.broadcast %1 : vector<1x8xf32> to vector<8x8xf32>
    %4 = arith.subf %2, %3 : vector<8x8xf32>
    %cst = arith.constant 0.000000e+00 : f32
    %5 = vector.broadcast %cst : f32 to vector<8x8xf32>
    %6 = arith.cmpf oeq, %4, %5 : vector<8x8xf32>
    %7 = arith.extui %6 : vector<8x8xi1> to vector<8x8xi32>
    %8 = arith.sitofp %7 : vector<8x8xi32> to vector<8x8xf32>
    %cst_3 = arith.constant dense<0.000000e+00> : vector<8xf32>
    %9 = vector.multi_reduction <add>, %8, %cst_3 [1] : vector<8x8xf32> to vector<8xf32>
    %10 = vector.shape_cast %9 : vector<8xf32> to vector<8x1xf32>
    %cst_4 = arith.constant 1.000000e+00 : f32
    %11 = vector.broadcast %cst_4 : f32 to vector<8x1xf32>
    %12 = arith.divf %11, %10 : vector<8x1xf32>
    %cst_5 = arith.constant 9.99999993E-9 : f32
    %13 = vector.broadcast %cst_5 : f32 to vector<8x1xf32>
    %14 = arith.addf %12, %13 : vector<8x1xf32>
    %15 = math.log %14 : vector<8x1xf32>
    %cst_6 = arith.constant 0.000000e+00 : f32
    %16 = vector.broadcast %cst_6 : f32 to vector<8x8xf32>
    %17 = arith.cmpf ogt, %8, %16 : vector<8x8xf32>
    %cst_7 = arith.constant -18.420681 : f32
    %18 = vector.shape_cast %15 : vector<8x1xf32> to vector<8x1xf32>
    %19 = vector.broadcast %18 : vector<8x1xf32> to vector<8x8xf32>
    %20 = vector.broadcast %cst_7 : f32 to vector<8x8xf32>
    %21 = arith.select %17, %19, %20 : vector<8x8xi1>, vector<8x8xf32>
    %c0_8 = arith.constant 0 : index
    %c0_9 = arith.constant 0 : index
    %22 = vector.load %arg3[%c0_8, %c0_9] : memref<8x128xf32, #tpu.memory_space<vmem>>, vector<8x128xf32>
    %c0_10 = arith.constant 0 : index
    %c0_11 = arith.constant 0 : index
    %23 = vector.load %arg6[%c0_10, %c0_11] : memref<8x128xf32, #tpu.memory_space<vmem>>, vector<8x128xf32>
    %cst_12 = arith.constant dense<0.000000e+00> : vector<8x8xf32>
    %24 = tpu.matmul %22, %23, %cst_12 {dimension_numbers = #tpu.dot_dimension_numbers<[1], [1], [0], [0], [0, 0, 1, 0], [], []>} : vector<8x128xf32>, vector<8x128xf32>, vector<8x8xf32> -> vector<8x8xf32>
    %cst_13 = arith.constant 8.000000e+00 : f32
    %25 = vector.broadcast %cst_13 : f32 to vector<8x8xf32>
    %26 = arith.mulf %25, %24 : vector<8x8xf32>
    %cst_14 = arith.constant dense<0xFF800000> : vector<8xf32>
    %27 = vector.multi_reduction <maximumf>, %26, %cst_14 [1] : vector<8x8xf32> to vector<8xf32>
    %28 = vector.shape_cast %27 : vector<8xf32> to vector<8x1xf32>
    %29 = vector.broadcast %28 : vector<8x1xf32> to vector<8x8xf32>
    %30 = arith.subf %26, %29 : vector<8x8xf32>
    %31 = math.exp %30 : vector<8x8xf32>
    %cst_15 = arith.constant dense<0.000000e+00> : vector<8xf32>
    %32 = vector.multi_reduction <add>, %31, %cst_15 [1] : vector<8x8xf32> to vector<8xf32>
    %33 = vector.shape_cast %32 : vector<8xf32> to vector<8x1xf32>
    %34 = arith.subf %30, %21 : vector<8x8xf32>
    %35 = arith.mulf %31, %34 : vector<8x8xf32>
    %cst_16 = arith.constant dense<0.000000e+00> : vector<8xf32>
    %36 = vector.multi_reduction <add>, %35, %cst_16 [1] : vector<8x8xf32> to vector<8xf32>
    %37 = vector.shape_cast %36 : vector<8xf32> to vector<8x1xf32>
    %38 = arith.divf %37, %33 : vector<8x1xf32>
    %39 = math.log %33 : vector<8x1xf32>
    %40 = arith.subf %38, %39 : vector<8x1xf32>
    %c0_17 = arith.constant 0 : index
    %c0_18 = arith.constant 0 : index
    %41 = vector.load %arg4[%c0_17, %c0_18] : memref<8x128xf32, #tpu.memory_space<vmem>>, vector<8x128xf32>
    %c0_19 = arith.constant 0 : index
    %c0_20 = arith.constant 0 : index
    %42 = vector.load %arg5[%c0_19, %c0_20] : memref<8x128xf32, #tpu.memory_space<vmem>>, vector<8x128xf32>
    %cst_21 = arith.constant dense<0.000000e+00> : vector<8x8xf32>
    %43 = tpu.matmul %41, %42, %cst_21 {dimension_numbers = #tpu.dot_dimension_numbers<[1], [1], [0], [0], [0, 0, 1, 0], [], []>} : vector<8x128xf32>, vector<8x128xf32>, vector<8x8xf32> -> vector<8x8xf32>
    %cst_22 = arith.constant 8.000000e+00 : f32
    %44 = vector.broadcast %cst_22 : f32 to vector<8x8xf32>
    %45 = arith.mulf %44, %43 : vector<8x8xf32>
    %cst_23 = arith.constant dense<0xFF800000> : vector<8xf32>
    %46 = vector.multi_reduction <maximumf>, %45, %cst_23 [1] : vector<8x8xf32> to vector<8xf32>
    %47 = vector.shape_cast %46 : vector<8xf32> to vector<8x1xf32>
    %48 = vector.broadcast %47 : vector<8x1xf32> to vector<8x8xf32>
    %49 = arith.subf %45, %48 : vector<8x8xf32>
    %50 = math.exp %49 : vector<8x8xf32>
    %cst_24 = arith.constant dense<0.000000e+00> : vector<8xf32>
    %51 = vector.multi_reduction <add>, %50, %cst_24 [1] : vector<8x8xf32> to vector<8xf32>
    %52 = vector.shape_cast %51 : vector<8xf32> to vector<8x1xf32>
    %53 = arith.subf %49, %21 : vector<8x8xf32>
    %54 = arith.mulf %50, %53 : vector<8x8xf32>
    %cst_25 = arith.constant dense<0.000000e+00> : vector<8xf32>
    %55 = vector.multi_reduction <add>, %54, %cst_25 [1] : vector<8x8xf32> to vector<8xf32>
    %56 = vector.shape_cast %55 : vector<8xf32> to vector<8x1xf32>
    %57 = arith.divf %56, %52 : vector<8x1xf32>
    %58 = math.log %52 : vector<8x1xf32>
    %59 = arith.subf %57, %58 : vector<8x1xf32>
    %60 = arith.addf %40, %59 : vector<8x1xf32>
    %cst_26 = arith.constant dense<0.000000e+00> : vector<1xf32>
    %61 = vector.multi_reduction <add>, %60, %cst_26 [0] : vector<8x1xf32> to vector<1xf32>
    %62 = vector.shape_cast %61 : vector<1xf32> to vector<1x1xf32>
    %63 = vector.shape_cast %62 : vector<1x1xf32> to vector<1x1xf32>
    %64 = vector.broadcast %63 : vector<1x1xf32> to vector<8x128xf32>
    %c0_27 = arith.constant 0 : index
    %c0_28 = arith.constant 0 : index
    %c0_29 = arith.constant 0 : index
    %65 = vector.load %arg7[%c0_27, %c0_28, %c0_29] : memref<1x8x128xf32, #tpu.memory_space<vmem>>, vector<1x8x128xf32>
    %66 = vector.shape_cast %65 : vector<1x8x128xf32> to vector<8x128xf32>
    %67 = vector.shape_cast %64 : vector<8x128xf32> to vector<1x8x128xf32>
    tpu.vector_store %arg7[%c0_27, %c0_28, %c0_29], %67 {strides = array<i32>} : memref<1x8x128xf32, #tpu.memory_space<vmem>>, vector<1x8x128xf32>,
    return
  }
  func.func @transform_0(%arg0: i32) -> (i32, i32) {
    %c0_i32 = arith.constant 0 : i32
    %c0_i32_0 = arith.constant 0 : i32
    return %arg0, %c0_i32 : i32, i32
  }
  func.func @transform_1(%arg0: i32) -> (i32, i32) {
    %c0_i32 = arith.constant 0 : i32
    %c0_i32_0 = arith.constant 0 : i32
    %c0_i32_1 = arith.constant 0 : i32
    return %c0_i32, %c0_i32_0 : i32, i32
  }
  func.func @transform_2(%arg0: i32) -> (i32, i32) {
    %c0_i32 = arith.constant 0 : i32
    %c0_i32_0 = arith.constant 0 : i32
    return %arg0, %c0_i32 : i32, i32
  }
  func.func @transform_3(%arg0: i32) -> (i32, i32) {
    %c0_i32 = arith.constant 0 : i32
    %c0_i32_0 = arith.constant 0 : i32
    return %arg0, %c0_i32 : i32, i32
  }
  func.func @transform_4(%arg0: i32) -> (i32, i32) {
    %c0_i32 = arith.constant 0 : i32
    %c0_i32_0 = arith.constant 0 : i32
    %c0_i32_1 = arith.constant 0 : i32
    return %c0_i32, %c0_i32_0 : i32, i32
  }
  func.func @transform_5(%arg0: i32) -> (i32, i32) {
    %c0_i32 = arith.constant 0 : i32
    %c0_i32_0 = arith.constant 0 : i32
    %c0_i32_1 = arith.constant 0 : i32
    return %c0_i32, %c0_i32_0 : i32, i32
  }
  func.func @transform_6(%arg0: i32) -> (i32, i32, i32) {
    %c0_i32 = arith.constant 0 : i32
    %c0_i32_0 = arith.constant 0 : i32
    %c0_i32_1 = arith.constant 0 : i32
    return %arg0, %c0_i32, %c0_i32_0 : i32, i32, i32
  }
}

</mosaic_0001>

<bundles_post_ra>
// kernel: tpu_custom_call.1
= control target key start
LH: loop header
LB: loop body
LE: loop exit
PB: predicated region body
PF: predicated region fallthrough
CT: control target
= control target key end

     0   :  { %11 = vsyncpa [#allocation3], 0  ;;  %s491_s0 = inlined_call_operand.vmem [shape: f32[8,1], index: 0, kind: input, shape index: {}]   ;;  %s492_s1 = inlined_call_operand.hbm [shape: f32[1,8], index: 1, kind: input, shape index: {}]   ;;  %s493_s2 = inlined_call_operand.vmem [shape: f32[8,128], index: 2, kind: input, shape index: {}]   ;;  %s494_s3 = inlined_call_operand.vmem [shape: f32[8,128], index: 3, kind: input, shape index: {}]   ;;  %s495_s4 = inlined_call_operand.vmem [shape: f32[8,128], index: 4, kind: input, shape index: {}]   ;;  %s496_s5 = inlined_call_operand.hbm [shape: f32[8,128], index: 5, kind: input, shape index: {}]   ;;  %s497_s6 = inlined_call_operand.hbm [shape: f32[1,8,128], index: 6, kind: output, shape index: {}]  }
   0x1   :  { %12 = vsyncpa [#allocation6], 0 }
   0x2   :  { %13 = vsyncpa [#allocation4], 0  ;;  %s395_s21 = smov [#allocation2]   ;;  %s396_s23 = smov [#allocation5]  }
   0x3   :  { %s22_s22 = sshll.u32 %s395_s21, 4  ;;  %s38_s24 = sshll.u32 %s396_s23, 4  ;;  %s23_s22 = int_to_ptr.vmem [resolvable:$true] %s22_s22  ;;  %s39_s24 = int_to_ptr.vmem [resolvable:$true] %s38_s24 }
   0x4   :  { %s323_s27 = scalar_lea.hbm %s492_s1, 16 }
   0x5   :  { %p324_p0 = scmp.ne.s32.totalorder %s492_s1, %s323_s27  ;;  %p327_p1 = scmp.lt.u32.totalorder %s323_s27, %s492_s1 }
   0x7   :  { %p329_p2 = pnand %p327_p1, %p324_p0 }
   0x9   :  { %332 = shalt.err (!%p329_p2)
}
   0xa   :  { %s333_s8 = scalar_lea.vmem %s23_s22, 16  ;;  %s337_s9 = scalar_lea.vmem %s23_s22, 32 }
   0xb   :  { %p334_p3 = scmp.ne.s32.totalorder %s23_s22, %s333_s8  ;;  %p338_p4 = scmp.lt.s32.totalorder %s23_s22, %s23_s22 }
   0xc   :  { %p339_p5 = scmp.lt.s32.totalorder %s337_s9, %s333_s8 }
   0xe   :  { %p340_p6 = por %p339_p5, %p338_p4 }
  0x10   :  { %p341_p7 = pnand %p340_p6, %p334_p3 }
  0x12   :  { %344 = shalt.err (!%p341_p7)
}
  0x13   :  { %25 = dma.hbm_to_vmem [thread:$0]  %s492_s1, 16, %s23_s22, [#allocation3]  }
  0x14   :  { %s345_s14 = scalar_lea.hbm %s496_s5, 128 }
  0x15   :  { %p346_p8 = scmp.ne.s32.totalorder %s496_s5, %s345_s14  ;;  %p349_p9 = scmp.lt.u32.totalorder %s345_s14, %s496_s5 }
  0x17   :  { %p351_p10 = pnand %p349_p9, %p346_p8 }
  0x19   :  { %354 = shalt.err (!%p351_p10)
}
  0x1a   :  { %s355_s19 = scalar_lea.vmem %s39_s24, 128  ;;  %p360_p12 = scmp.lt.s32.totalorder %s39_s24, %s39_s24 }
  0x1b   :  { %p356_p11 = scmp.ne.s32.totalorder %s39_s24, %s355_s19  ;;  %p361_p13 = scmp.lt.s32.totalorder %s355_s19, %s355_s19 }
  0x1d   :  { %p362_p0 = por %p361_p13, %p360_p12 }
  0x1f   :  { %p363_p1 = pnand %p362_p0, %p356_p11 }
  0x21   :  { %366 = shalt.err (!%p363_p1)
}
  0x22   :  { %41 = dma.hbm_to_vmem [thread:$0]  %s496_s5, 128, %s39_s24, [#allocation6]  }
  0x23   :  { %389 = dma.done.wait [#allocation3], 16  }
  0x24   :  { %390 = vsyncadd [#allocation3], 4294967280 }
  0x25   :  { %391 = dma.done.wait [#allocation6], 128  }
  0x26   :  { %392 = vsyncadd [#allocation6], 4294967168  ;;  %v397_v0 = vmov 0.0   ;;  %v398_v1 = vmov 0   ;;  %vm399_vm0 = vmmov 0   ;;  %v77_v2 = vld [vmem:[#allocation5] sm:$0xff] }
  0x27   :  { %290 = vmatprep.subr.mxu0 %v397_v0  ;;  %306 = vset.pattern.permute.xlu0 %v398_v1  ;;  %v48_v3 = vld [vmem:[%s491_s0] sm:$0xff]  ;;  %v284_v7 = vld [vmem:[#allocation2] ss:$0 sm:$0xff]  ;;  %vm65_vm1 = vcmask 64512   ;;  %s400_s0 = smov [#allocation7]  }
  0x28   :  { %292 = vmatprep.mubr.msk.f32.mxu0 %vm399_vm0, %v397_v0  ;;  %295 = vmatprep.subr.mxu1 %v397_v0  ;;  %v76_v4 = vld [vmem:[%s493_s2] sm:$0xff]  ;;  %s274_s2 = sshll.u32 %s400_s0, 4  ;;  %s275_s2 = int_to_ptr.vmem [resolvable:$true] %s274_s2 }
  0x29   :  { %297 = vmatprep.mubr.msk.f32.mxu1 %vm399_vm0, %v397_v0  ;;  %291 = vmatpush3.xpose.msra.mxu0 %v77_v2  ;;  %v169_v5 = vld [vmem:[%s495_s4] sm:$0xff]  ;;  %p372_p3 = scmp.lt.s32.totalorder %s275_s2, %s275_s2 }
  0x2a   :  { %52 = vperm.xlu0 %306, %v48_v3   ;;  %296 = vmatpush3.xpose.msra.mxu1 %v169_v5  ;;  %v168_v6 = vld [vmem:[%s494_s3] sm:$0xff]  ;;  %s367_s3 = scalar_lea.vmem %s275_s2, 128 }
  0x2b   :  { %p368_p2 = scmp.ne.s32.totalorder %s275_s2, %s367_s3  ;;  %p373_p4 = scmp.lt.s32.totalorder %s367_s3, %s367_s3 }
  0x2c   :  { %293 = vmatmul.mubr.f32.vlgmr.msra.gmra.mrb[0].mxu0 %v76_v4 }
  0x2d   :  { %298 = vmatmul.mubr.f32.vlgmr.msra.gmra.mrb[0].mxu1 %v168_v6  ;;  %p374_p5 = por %p373_p4, %p372_p3 }
  0x2f   :  { %p375_p6 = pnand %p374_p5, %p368_p2 }
  0xa9   :  { %v53_v8 = vpop.permute.xlu0 %52 }
  0xaa   :  { %v61_v9 = vsub.f32 %v53_v8, %v284_v7 }
  0xac   :  { %vm62_vm2 = vcmp.eq.f32.partialorder %v61_v9, 0.0 }
  0xad   :  { %v285_v10 = vsel %vm62_vm2, 1.0, %v397_v0 }
  0xae   :  { %v66_v11 = vsel %vm65_vm1, %v285_v10, 0.0  ;;  %vm74_vm3 = vcmp.gt.f32.partialorder %v285_v10, 0.0 }
  0xaf   :  { %67 = vadd.xlane.f32.xlu0 %v66_v11 }
  0xff   :  { %v144_v12 = vpop.f32.mrb[0].mxu0 }
 0x100   :  { %v148_v13 = vmul.f32 8.0, %v144_v12  ;;  %v294_v14 = vpop.f32.mrb[1].mxu0  ;;  %v236_v15 = vpop.f32.mrb[0].mxu1 }
 0x101   :  { %v240_v16 = vmul.f32 8.0, %v236_v15  ;;  %v299_v17 = vpop.f32.mrb[1].mxu1 }
 0x102   :  { %v149_v18 = vsel %vm65_vm1, %v148_v13, -inf }
 0x103   :  { %150 = vmax.xlane.f32.xlu1 %v149_v18  ;;  %v241_v19 = vsel %vm65_vm1, %v240_v16, -inf }
 0x107   :  { %242 = vmax.xlane.f32.xlu1 %v241_v19 }
 0x13c   :  { %v68_v20 = vpop.xlane.xlu0 %67 }
 0x13d   :  { %307 = vrcp.f32 %v68_v20 }
 0x147   :  { %v308_v21 = vpop.eup %307 }
 0x148   :  { %v71_v22 = vadd.f32 1e-08, %v308_v21 }
 0x14a   :  { %309 = vlog2.f32 %v71_v22 }
 0x154   :  { %v310_v29 = vpop.eup %309 }
 0x155   :  { %v73_v30 = vmul.f32 0.6931472, %v310_v29 }
 0x157   :  { %v75_v33 = vsel %vm74_vm3, %v73_v30, -18.420681 }
 0x190   :  { %v151_v23 = vpop.xlane.xlu1 %150 }
 0x191   :  { %v152_v24 = vsub.f32 %v148_v13, %v151_v23 }
 0x193   :  { %v153_v25 = vmul.f32 1.442695, %v152_v24  ;;  %v158_v34 = vsub.f32 %v152_v24, %v75_v33 }
 0x194   :  { %v243_v26 = vpop.xlane.xlu1 %242 }
 0x195   :  { %311 = vpow2.f32 %v153_v25  ;;  %v244_v27 = vsub.f32 %v240_v16, %v243_v26 }
 0x197   :  { %v245_v28 = vmul.f32 1.442695, %v244_v27  ;;  %v250_v38 = vsub.f32 %v244_v27, %v75_v33 }
 0x199   :  { %313 = vpow2.f32 %v245_v28 }
 0x19f   :  { %v312_v31 = vpop.eup %311 }
 0x1a0   :  { %v155_v32 = vsel %vm65_vm1, %v312_v31, 0.0  ;;  %v159_v37 = vmul.f32 %v312_v31, %v158_v34 }
 0x1a1   :  { %156 = vadd.xlane.f32.xlu1 %v155_v32 }
 0x1a2   :  { %v160_v39 = vsel %vm65_vm1, %v159_v37, 0.0 }
 0x1a3   :  { %v314_v35 = vpop.eup %313 }
 0x1a4   :  { %v247_v36 = vsel %vm65_vm1, %v314_v35, 0.0  ;;  %v251_v40 = vmul.f32 %v314_v35, %v250_v38 }
 0x1a5   :  { %248 = vadd.xlane.f32.xlu1 %v247_v36 }
 0x1a6   :  { %v252_v41 = vsel %vm65_vm1, %v251_v40, 0.0 }
 0x1a9   :  { %161 = vadd.xlane.f32.xlu1 %v160_v39 }
 0x1ad   :  { %253 = vadd.xlane.f32.xlu1 %v252_v41 }
 0x22e   :  { %v157_v42 = vpop.xlane.xlu1 %156 }
 0x22f   :  { %315 = vrcp.f32 %v157_v42 }
 0x230   :  { %317 = vlog2.f32 %v157_v42 }
 0x232   :  { %v249_v43 = vpop.xlane.xlu1 %248 }
 0x233   :  { %319 = vrcp.f32 %v249_v43 }
 0x234   :  { %321 = vlog2.f32 %v249_v43 }
 0x236   :  { %v162_v44 = vpop.xlane.xlu1 %161 }
 0x239   :  { %v316_v45 = vpop.eup %315 }
 0x23a   :  { %v318_v46 = vpop.eup %317  ;;  %v164_v49 = vmul.f32 %v316_v45, %v162_v44  ;;  %v254_v50 = vpop.xlane.xlu1 %253 }
 0x23b   :  { %v166_v48 = vmul.f32 0.6931472, %v318_v46 }
 0x23d   :  { %v320_v47 = vpop.eup %319  ;;  %v167_v54 = vsub.f32 %v164_v49, %v166_v48 }
 0x23e   :  { %v322_v51 = vpop.eup %321  ;;  %v256_v52 = vmul.f32 %v320_v47, %v254_v50 }
 0x23f   :  { %v258_v53 = vmul.f32 0.6931472, %v322_v51 }
 0x241   :  { %v259_v55 = vsub.f32 %v256_v52, %v258_v53 }
 0x243   :  { %v260_v56 = vadd.f32 %v259_v55, %v167_v54 }
 0x245   :  { %v261_v57 = vrot.slane %v260_v56, 4 }
 0x247   :  { %v262_v58 = vadd.f32 %v261_v57, %v260_v56 }
 0x249   :  { %v263_v59 = vrot.slane %v262_v58, 2 }
 0x24b   :  { %v264_v60 = vadd.f32 %v263_v59, %v262_v58 }
 0x24d   :  { %v265_v61 = vrot.slane %v264_v60, 1 }
 0x24f   :  { %v266_v62 = vadd.f32 %v265_v61, %v264_v60 }
 0x251   :  { %267 = vst [vmem:[#allocation7] sm:$0xff] %v266_v62 }
 0x252   :  { %378 = shalt.err (!%p375_p6)
}
 0x253   :  { %s379_s29 = scalar_lea.hbm %s497_s6, 128 }
 0x254   :  { %p380_p7 = scmp.ne.s32.totalorder %s497_s6, %s379_s29  ;;  %p383_p8 = scmp.lt.u32.totalorder %s379_s29, %s497_s6 }
 0x256   :  { %p385_p9 = pnand %p383_p8, %p380_p7 }
 0x258   :  { %388 = shalt.err (!%p385_p9)
}
 0x259   :  { %277 = dma.vmem_to_hbm [thread:$0]  %s275_s2, 128, %s497_s6, [#allocation4]  }
 0x25a   :  { %393 = dma.done.wait [#allocation4], 128  }
 0x25b   :  { %394 = vsyncadd [#allocation4], 4294967168 }
 0x25c   :  { %281 = vsyncpa [#allocation3], 1 }
 0x25d   :  { %282 = vsyncpa [#allocation6], 1 }
 0x25e   :  { %283 = vsyncpa [#allocation4], 1 }

// kernel: tpu_custom_call.1
= control target key start
LH: loop header
LB: loop body
LE: loop exit
PB: predicated region body
PF: predicated region fallthrough
CT: control target
= control target key end

     0   :  { %11 = vsyncpa [#allocation3], 0  ;;  %s491_s0 = inlined_call_operand.vmem [shape: f32[8,1], index: 0, kind: input, shape index: {}]   ;;  %s492_s1 = inlined_call_operand.hbm [shape: f32[1,8], index: 1, kind: input, shape index: {}]   ;;  %s493_s2 = inlined_call_operand.vmem [shape: f32[8,128], index: 2, kind: input, shape index: {}]   ;;  %s494_s3 = inlined_call_operand.vmem [shape: f32[8,128], index: 3, kind: input, shape index: {}]   ;;  %s495_s4 = inlined_call_operand.vmem [shape: f32[8,128], index: 4, kind: input, shape index: {}]   ;;  %s496_s5 = inlined_call_operand.hbm [shape: f32[8,128], index: 5, kind: input, shape index: {}]   ;;  %s497_s6 = inlined_call_operand.hbm [shape: f32[1,8,128], index: 6, kind: output, shape index: {}]  }
   0x1   :  { %12 = vsyncpa [#allocation6], 0 }
   0x2   :  { %13 = vsyncpa [#allocation4], 0  ;;  %s395_s21 = smov [#allocation2]   ;;  %s396_s23 = smov [#allocation5]  }
   0x3   :  { %s22_s22 = sshll.u32 %s395_s21, 4  ;;  %s38_s24 = sshll.u32 %s396_s23, 4  ;;  %s23_s22 = int_to_ptr.vmem [resolvable:$true] %s22_s22  ;;  %s39_s24 = int_to_ptr.vmem [resolvable:$true] %s38_s24 }
   0x4   :  { %s323_s27 = scalar_lea.hbm %s492_s1, 16 }
   0x5   :  { %p324_p0 = scmp.ne.s32.totalorder %s492_s1, %s323_s27  ;;  %p327_p1 = scmp.lt.u32.totalorder %s323_s27, %s492_s1 }
   0x7   :  { %p329_p2 = pnand %p327_p1, %p324_p0 }
   0x9   :  { %332 = shalt.err (!%p329_p2)
}
   0xa   :  { %s333_s8 = scalar_lea.vmem %s23_s22, 16  ;;  %s337_s9 = scalar_lea.vmem %s23_s22, 32 }
   0xb   :  { %p334_p3 = scmp.ne.s32.totalorder %s23_s22, %s333_s8  ;;  %p338_p4 = scmp.lt.s32.totalorder %s23_s22, %s23_s22 }
   0xc   :  { %p339_p5 = scmp.lt.s32.totalorder %s337_s9, %s333_s8 }
   0xe   :  { %p340_p6 = por %p339_p5, %p338_p4 }
  0x10   :  { %p341_p7 = pnand %p340_p6, %p334_p3 }
  0x12   :  { %344 = shalt.err (!%p341_p7)
}
  0x13   :  { %25 = dma.hbm_to_vmem [thread:$0]  %s492_s1, 16, %s23_s22, [#allocation3]  }
  0x14   :  { %s345_s14 = scalar_lea.hbm %s496_s5, 128 }
  0x15   :  { %p346_p8 = scmp.ne.s32.totalorder %s496_s5, %s345_s14  ;;  %p349_p9 = scmp.lt.u32.totalorder %s345_s14, %s496_s5 }
  0x17   :  { %p351_p10 = pnand %p349_p9, %p346_p8 }
  0x19   :  { %354 = shalt.err (!%p351_p10)
}
  0x1a   :  { %s355_s19 = scalar_lea.vmem %s39_s24, 128  ;;  %p360_p12 = scmp.lt.s32.totalorder %s39_s24, %s39_s24 }
  0x1b   :  { %p356_p11 = scmp.ne.s32.totalorder %s39_s24, %s355_s19  ;;  %p361_p13 = scmp.lt.s32.totalorder %s355_s19, %s355_s19 }
  0x1d   :  { %p362_p0 = por %p361_p13, %p360_p12 }
  0x1f   :  { %p363_p1 = pnand %p362_p0, %p356_p11 }
  0x21   :  { %366 = shalt.err (!%p363_p1)
}
  0x22   :  { %41 = dma.hbm_to_vmem [thread:$0]  %s496_s5, 128, %s39_s24, [#allocation6]  }
  0x23   :  { %389 = dma.done.wait [#allocation3], 16  }
  0x24   :  { %390 = vsyncadd [#allocation3], 4294967280 }
  0x25   :  { %391 = dma.done.wait [#allocation6], 128  }
  0x26   :  { %392 = vsyncadd [#allocation6], 4294967168  ;;  %v397_v0 = vmov 0.0   ;;  %v398_v1 = vmov 0   ;;  %vm399_vm0 = vmmov 0   ;;  %v77_v2 = vld [vmem:[#allocation5] sm:$0xff] }
  0x27   :  { %290 = vmatprep.subr.mxu0 %v397_v0  ;;  %306 = vset.pattern.permute.xlu0 %v398_v1  ;;  %v48_v3 = vld [vmem:[%s491_s0] sm:$0xff]  ;;  %v284_v7 = vld [vmem:[#allocation2] ss:$0 sm:$0xff]  ;;  %vm65_vm1 = vcmask 64512   ;;  %s400_s0 = smov [#allocation7]  }
  0x28   :  { %292 = vmatprep.mubr.msk.f32.mxu0 %vm399_vm0, %v397_v0  ;;  %295 = vmatprep.subr.mxu1 %v397_v0  ;;  %v76_v4 = vld [vmem:[%s493_s2] sm:$0xff]  ;;  %s274_s2 = sshll.u32 %s400_s0, 4  ;;  %s275_s2 = int_to_ptr.vmem [resolvable:$true] %s274_s2 }
  0x29   :  { %297 = vmatprep.mubr.msk.f32.mxu1 %vm399_vm0, %v397_v0  ;;  %291 = vmatpush3.xpose.msra.mxu0 %v77_v2  ;;  %v169_v5 = vld [vmem:[%s495_s4] sm:$0xff]  ;;  %p372_p3 = scmp.lt.s32.totalorder %s275_s2, %s275_s2 }
  0x2a   :  { %52 = vperm.xlu0 %306, %v48_v3   ;;  %296 = vmatpush3.xpose.msra.mxu1 %v169_v5  ;;  %v168_v6 = vld [vmem:[%s494_s3] sm:$0xff]  ;;  %s367_s3 = scalar_lea.vmem %s275_s2, 128 }
  0x2b   :  { %p368_p2 = scmp.ne.s32.totalorder %s275_s2, %s367_s3  ;;  %p373_p4 = scmp.lt.s32.totalorder %s367_s3, %s367_s3 }
  0x2c   :  { %293 = vmatmul.mubr.f32.vlgmr.msra.gmra.mrb[0].mxu0 %v76_v4 }
  0x2d   :  { %298 = vmatmul.mubr.f32.vlgmr.msra.gmra.mrb[0].mxu1 %v168_v6  ;;  %p374_p5 = por %p373_p4, %p372_p3 }
  0x2f   :  { %p375_p6 = pnand %p374_p5, %p368_p2 }
  0xa9   :  { %v53_v8 = vpop.permute.xlu0 %52 }
  0xaa   :  { %v61_v9 = vsub.f32 %v53_v8, %v284_v7 }
  0xac   :  { %vm62_vm2 = vcmp.eq.f32.partialorder %v61_v9, 0.0 }
  0xad   :  { %v285_v10 = vsel %vm62_vm2, 1.0, %v397_v0 }
  0xae   :  { %v66_v11 = vsel %vm65_vm1, %v285_v10, 0.0  ;;  %vm74_vm3 = vcmp.gt.f32.partialorder %v285_v10, 0.0 }
  0xaf   :  { %67 = vadd.xlane.f32.xlu0 %v66_v11 }
  0xff   :  { %v144_v12 = vpop.f32.mrb[0].mxu0 }
 0x100   :  { %v148_v13 = vmul.f32 8.0, %v144_v12  ;;  %v294_v14 = vpop.f32.mrb[1].mxu0  ;;  %v236_v15 = vpop.f32.mrb[0].mxu1 }
 0x101   :  { %v240_v16 = vmul.f32 8.0, %v236_v15  ;;  %v299_v17 = vpop.f32.mrb[1].mxu1 }
 0x102   :  { %v149_v18 = vsel %vm65_vm1, %v148_v13, -inf }
 0x103   :  { %150 = vmax.xlane.f32.xlu1 %v149_v18  ;;  %v241_v19 = vsel %vm65_vm1, %v240_v16, -inf }
 0x107   :  { %242 = vmax.xlane.f32.xlu1 %v241_v19 }
 0x13c   :  { %v68_v20 = vpop.xlane.xlu0 %67 }
 0x13d   :  { %307 = vrcp.f32 %v68_v20 }
 0x147   :  { %v308_v21 = vpop.eup %307 }
 0x148   :  { %v71_v22 = vadd.f32 1e-08, %v308_v21 }
 0x14a   :  { %309 = vlog2.f32 %v71_v22 }
 0x154   :  { %v310_v29 = vpop.eup %309 }
 0x155   :  { %v73_v30 = vmul.f32 0.6931472, %v310_v29 }
 0x157   :  { %v75_v33 = vsel %vm74_vm3, %v73_v30, -18.420681 }
 0x190   :  { %v151_v23 = vpop.xlane.xlu1 %150 }
 0x191   :  { %v152_v24 = vsub.f32 %v148_v13, %v151_v23 }
 0x193   :  { %v153_v25 = vmul.f32 1.442695, %v152_v24  ;;  %v158_v34 = vsub.f32 %v152_v24, %v75_v33 }
 0x194   :  { %v243_v26 = vpop.xlane.xlu1 %242 }
 0x195   :  { %311 = vpow2.f32 %v153_v25  ;;  %v244_v27 = vsub.f32 %v240_v16, %v243_v26 }
 0x197   :  { %v245_v28 = vmul.f32 1.442695, %v244_v27  ;;  %v250_v38 = vsub.f32 %v244_v27, %v75_v33 }
 0x199   :  { %313 = vpow2.f32 %v245_v28 }
 0x19f   :  { %v312_v31 = vpop.eup %311 }
 0x1a0   :  { %v155_v32 = vsel %vm65_vm1, %v312_v31, 0.0  ;;  %v159_v37 = vmul.f32 %v312_v31, %v158_v34 }
 0x1a1   :  { %156 = vadd.xlane.f32.xlu1 %v155_v32 }
 0x1a2   :  { %v160_v39 = vsel %vm65_vm1, %v159_v37, 0.0 }
 0x1a3   :  { %v314_v35 = vpop.eup %313 }
 0x1a4   :  { %v247_v36 = vsel %vm65_vm1, %v314_v35, 0.0  ;;  %v251_v40 = vmul.f32 %v314_v35, %v250_v38 }
 0x1a5   :  { %248 = vadd.xlane.f32.xlu1 %v247_v36 }
 0x1a6   :  { %v252_v41 = vsel %vm65_vm1, %v251_v40, 0.0 }
 0x1a9   :  { %161 = vadd.xlane.f32.xlu1 %v160_v39 }
 0x1ad   :  { %253 = vadd.xlane.f32.xlu1 %v252_v41 }
 0x22e   :  { %v157_v42 = vpop.xlane.xlu1 %156 }
 0x22f   :  { %315 = vrcp.f32 %v157_v42 }
 0x230   :  { %317 = vlog2.f32 %v157_v42 }
 0x232   :  { %v249_v43 = vpop.xlane.xlu1 %248 }
 0x233   :  { %319 = vrcp.f32 %v249_v43 }
 0x234   :  { %321 = vlog2.f32 %v249_v43 }
 0x236   :  { %v162_v44 = vpop.xlane.xlu1 %161 }
 0x239   :  { %v316_v45 = vpop.eup %315 }
 0x23a   :  { %v318_v46 = vpop.eup %317  ;;  %v164_v49 = vmul.f32 %v316_v45, %v162_v44  ;;  %v254_v50 = vpop.xlane.xlu1 %253 }
 0x23b   :  { %v166_v48 = vmul.f32 0.6931472, %v318_v46 }
 0x23d   :  { %v320_v47 = vpop.eup %319  ;;  %v167_v54 = vsub.f32 %v164_v49, %v166_v48 }
 0x23e   :  { %v322_v51 = vpop.eup %321  ;;  %v256_v52 = vmul.f32 %v320_v47, %v254_v50 }
 0x23f   :  { %v258_v53 = vmul.f32 0.6931472, %v322_v51 }
 0x241   :  { %v259_v55 = vsub.f32 %v256_v52, %v258_v53 }
 0x243   :  { %v260_v56 = vadd.f32 %v259_v55, %v167_v54 }
 0x245   :  { %v261_v57 = vrot.slane %v260_v56, 4 }
 0x247   :  { %v262_v58 = vadd.f32 %v261_v57, %v260_v56 }
 0x249   :  { %v263_v59 = vrot.slane %v262_v58, 2 }
 0x24b   :  { %v264_v60 = vadd.f32 %v263_v59, %v262_v58 }
 0x24d   :  { %v265_v61 = vrot.slane %v264_v60, 1 }
 0x24f   :  { %v266_v62 = vadd.f32 %v265_v61, %v264_v60 }
 0x251   :  { %267 = vst [vmem:[#allocation7] sm:$0xff] %v266_v62 }
 0x252   :  { %378 = shalt.err (!%p375_p6)
}
 0x253   :  { %s379_s29 = scalar_lea.hbm %s497_s6, 128 }
 0x254   :  { %p380_p7 = scmp.ne.s32.totalorder %s497_s6, %s379_s29  ;;  %p383_p8 = scmp.lt.u32.totalorder %s379_s29, %s497_s6 }
 0x256   :  { %p385_p9 = pnand %p383_p8, %p380_p7 }
 0x258   :  { %388 = shalt.err (!%p385_p9)
}
 0x259   :  { %277 = dma.vmem_to_hbm [thread:$0]  %s275_s2, 128, %s497_s6, [#allocation4]  }
 0x25a   :  { %393 = dma.done.wait [#allocation4], 128  }
 0x25b   :  { %394 = vsyncadd [#allocation4], 4294967168 }
 0x25c   :  { %281 = vsyncpa [#allocation3], 1 }
 0x25d   :  { %282 = vsyncpa [#allocation6], 1 }
 0x25e   :  { %283 = vsyncpa [#allocation4], 1 }

</bundles_post_ra>
